<compile_context>
chip_gen: v5e
topology: v5e:2x2
jax: 0.10.0
libtpu: 0.0.40
codegen_flags: <defaults>
</compile_context>

<pallas_src>
import functools

import jax
import jax.numpy as jnp
import numpy as np
from jax.experimental import pallas as pl
from jax.experimental.pallas import tpu as pltpu

NUM_INPUTS_1 = 18          # 12 (pos/orien/vel/angvel split a) + 6 (split b)
NUM_INPUTS_2 = 4           # servo angles
HIDDEN = 64
BHIDDEN = 16

N_IN = 22                  # raw input features
N_H13 = HIDDEN + BHIDDEN   # 80  = [h1 | h3]
N_OUT = HIDDEN + BHIDDEN   # 80  = [h2 | h4]


def tilt_actor_kernel(x_ref, w_in_ref, b_in_ref, w_out_ref, b_out_ref, out_ref):
    # Cast to bf16 in-kernel (VPU cast is free; kernel is DMA-bound).
    x = x_ref[...].astype(jnp.bfloat16)                       # (TB, 22)
    # [h1 | h3] in one MXU matmul; bias-add + tanh in f32.
    h13 = jnp.tanh(
        jnp.dot(x, w_in_ref[...], preferred_element_type=jnp.float32)
        + b_in_ref[...])                                      # (TB, 80) f32
    # [h2 | h4] in one MXU matmul; f32 epilogue.
    out = jnp.tanh(
        jnp.dot(h13.astype(jnp.bfloat16), w_out_ref[...],
                preferred_element_type=jnp.float32)
        + b_out_ref[...])                                     # (TB, 80) f32
    out_ref[...] = out.astype(out_ref.dtype)


def _round_up(n, m):
    return (n + m - 1) // m * m


@functools.partial(jax.jit, static_argnames=("block_b", "out_dtype"))
def tilt_actor_forward(x, packed, *, block_b=2048, out_dtype=jnp.float32):
    """x: (B, 22) f32.  packed: dict from pack_params.  Returns (B, 80)."""
    B = x.shape[0]

    # Clamp user-supplied block_b to a multiple of 16, at least 16.
    block_b = max(16, (int(block_b) // 16) * 16)

    # Pick the batch tile: as large as block_b allows, but guarantee >=2 grid
    # steps once the (16-padded) batch permits it, so the "parallel" batch
    # axis can span both TensorCores on v7x.
    Bp16 = _round_up(max(B, 1), 16)
    TB = min(block_b, max(16, _round_up(pl.cdiv(Bp16, 2), 16)))
    Bp = _round_up(B, TB)

    # Batch padding only when needed (no wrapper dtype cast any more).
    xin = x if Bp == B else jnp.pad(x, ((0, Bp - B), (0, 0)))

    out_itemsize = np.dtype(out_dtype).itemsize
    cost = pl.CostEstimate(
        flops=2 * Bp * (N_IN * N_H13 + N_H13 * N_OUT),
        transcendentals=Bp * (N_H13 + N_OUT),
        bytes_accessed=(Bp * N_IN * 4            # x (f32 in)
                        + Bp * N_OUT * out_itemsize
                        + N_IN * N_H13 * 2 + N_H13 * N_OUT * 2   # bf16 weights
                        + (N_H13 + N_OUT) * 4))                  # f32 biases

    out = pl.pallas_call(
        tilt_actor_kernel,
        out_shape=jax.ShapeDtypeStruct((Bp, N_OUT), out_dtype),
        grid_spec=pltpu.PrefetchScalarGridSpec(
            num_scalar_prefetch=0,
            grid=(Bp // TB,),
            in_specs=[
                pl.BlockSpec((TB, N_IN), lambda i: (i, 0)),       # x batch tile
                pl.BlockSpec((N_IN, N_H13), lambda i: (0, 0)),    # W_in  (resident)
                pl.BlockSpec((1, N_H13), lambda i: (0, 0)),       # b_in  (resident)
                pl.BlockSpec((N_H13, N_OUT), lambda i: (0, 0)),   # W_out (resident)
                pl.BlockSpec((1, N_OUT), lambda i: (0, 0)),       # b_out (resident)
            ],
            out_specs=pl.BlockSpec((TB, N_OUT), lambda i: (i, 0)),
        ),
        compiler_params=pltpu.CompilerParams(
            dimension_semantics=("parallel",)),
        cost_estimate=cost,
    )(xin, packed["w_in"], packed["b_in"], packed["w_out"], packed["b_out"])

    return out if Bp == B else out[:B]


def init_params(key, *, bias_scale=0.0):
    """Orthogonal(gain=sqrt(2)) weights, constant-0 biases — mirrors
    init(m, orthogonal_, constant_(0), sqrt(2)).  Weights stored (in, out).
    `bias_scale` lets the test perturb biases to exercise the bias path."""
    ortho = jax.nn.initializers.orthogonal(scale=float(np.sqrt(2.0)))
    k1, k2, k3, k4, kb = jax.random.split(key, 5)
    w1 = ortho(k1, (NUM_INPUTS_1, HIDDEN), jnp.float32)            # (18, 64)
    w2 = ortho(k2, (HIDDEN, HIDDEN), jnp.float32)                  # (64, 64)
    w3 = ortho(k3, (NUM_INPUTS_2, BHIDDEN), jnp.float32)           # (4, 16)
    w4 = ortho(k4, (HIDDEN + BHIDDEN, BHIDDEN), jnp.float32)       # (80, 16)

    kb1, kb2, kb3, kb4 = jax.random.split(kb, 4)

    def bias(k, n):
        if bias_scale == 0.0:
            return jnp.zeros((n,), jnp.float32)
        return bias_scale * jax.random.normal(k, (n,), jnp.float32)

    return {"w1": w1, "b1": bias(kb1, HIDDEN),
            "w2": w2, "b2": bias(kb2, HIDDEN),
            "w3": w3, "b3": bias(kb3, BHIDDEN),
            "w4": w4, "b4": bias(kb4, BHIDDEN)}


def pack_params(p):
    """Pack the four Linear layers into the fused (22,80) / (80,80) weights."""
    w_in = jnp.zeros((N_IN, N_H13), jnp.float32)
    w_in = w_in.at[0:12, 0:HIDDEN].set(p["w1"][0:12])         # x[:,0:12]  -> h1
    w_in = w_in.at[16:22, 0:HIDDEN].set(p["w1"][12:18])       # x[:,16:22] -> h1
    w_in = w_in.at[12:16, HIDDEN:N_H13].set(p["w3"])          # x[:,12:16] -> h3
    b_in = jnp.concatenate([p["b1"], p["b3"]]).reshape(1, N_H13)

    w_out = jnp.zeros((N_H13, N_OUT), jnp.float32)
    w_out = w_out.at[0:HIDDEN, 0:HIDDEN].set(p["w2"])                   # h1 -> h2
    w_out = w_out.at[0:HIDDEN, HIDDEN:N_OUT].set(p["w4"][0:HIDDEN])     # h1 -> h4
    w_out = w_out.at[HIDDEN:N_H13, HIDDEN:N_OUT].set(p["w4"][HIDDEN:])  # h3 -> h4
    b_out = jnp.concatenate([p["b2"], p["b4"]]).reshape(1, N_OUT)

    return {"w_in": w_in.astype(jnp.bfloat16), "b_in": b_in,
            "w_out": w_out.astype(jnp.bfloat16), "b_out": b_out}


def tilt_actor_ref(x, p):
    """Pure-JAX reference matching the PyTorch forward exactly, using the same
    bf16 matmul-input casts the kernel uses (f32 accumulate, f32 tanh)."""
    bf = jnp.bfloat16

    def lin(a, w, b):
        return jnp.dot(a.astype(bf), w.astype(bf),
                       preferred_element_type=jnp.float32) + b

    x1 = jnp.concatenate([x[:, 0:12], x[:, 16:22]], axis=1)
    x2 = x[:, 12:16]
    h1 = jnp.tanh(lin(x1, p["w1"], p["b1"]))
    h2 = jnp.tanh(lin(h1, p["w2"], p["b2"]))
    h3 = jnp.tanh(lin(x2, p["w3"], p["b3"]))
    h4 = jnp.tanh(lin(jnp.concatenate([h1, h3], axis=1), p["w4"], p["b4"]))
    return jnp.concatenate([h2, h4], axis=1)


if __name__ == "__main__":
    key = jax.random.PRNGKey(0)
    k_x, k_p = jax.random.split(key)

    # Small deterministic test: B=40.  Run twice:
    #   * block_b=16 -> TB=16, Bp=48, grid=3: exercises batch padding,
    #     resident weights across grid steps, masked 80-lane output store.
    #   * default block_b -> TB=32, Bp=64, grid=2: exercises the >=2-step
    #     auto tile selection path.
    B = 40
    x = jax.random.normal(k_x, (B, N_IN), jnp.float32)
    raw = init_params(k_p, bias_scale=0.1)
    packed = pack_params(raw)
    ref = tilt_actor_ref(x, raw)

    out_small = jax.block_until_ready(tilt_actor_forward(x, packed, block_b=16))
    out_auto = jax.block_until_ready(tilt_actor_forward(x, packed))

    assert out_small.shape == (B, N_OUT)
    assert out_auto.shape == (B, N_OUT)
    np.testing.assert_allclose(np.asarray(out_small), np.asarray(ref),
                               rtol=5e-3, atol=5e-3)
    np.testing.assert_allclose(np.asarray(out_auto), np.asarray(ref),
                               rtol=5e-3, atol=5e-3)
    print("KERNEL_OK")
</pallas_src>

<mosaic_0001>
module attributes {stable_mosaic.version = 11 : i64} {
  func.func @tilt_actor_kernel(%arg0: i32, %arg1: memref<16x22xf32, #tpu.memory_space<vmem>>, %arg2: memref<22x80xbf16, #tpu.memory_space<vmem>>, %arg3: memref<1x80xf32, #tpu.memory_space<vmem>>, %arg4: memref<80x80xbf16, #tpu.memory_space<vmem>>, %arg5: memref<1x80xf32, #tpu.memory_space<vmem>>, %arg6: memref<16x80xf32, #tpu.memory_space<vmem>>) attributes {dimension_semantics = [#tpu.dimension_semantics<parallel>], iteration_bounds = array<i64: 3>, scalar_prefetch = 0 : i64, scratch_operands = 0 : i64, tpu.core_type = #tpu.core_type<tc>, window_params = [{transform_indices = @transform_0, window_bounds = array<i64: 16, 22>}, {pipeline_mode = #tpu.pipeline_mode<synchronous>, transform_indices = @transform_1, window_bounds = array<i64: 22, 80>}, {pipeline_mode = #tpu.pipeline_mode<synchronous>, transform_indices = @transform_2, window_bounds = array<i64: 1, 80>}, {pipeline_mode = #tpu.pipeline_mode<synchronous>, transform_indices = @transform_3, window_bounds = array<i64: 80, 80>}, {pipeline_mode = #tpu.pipeline_mode<synchronous>, transform_indices = @transform_4, window_bounds = array<i64: 1, 80>}, {transform_indices = @transform_5, window_bounds = array<i64: 16, 80>}]} {
    %c0 = arith.constant 0 : index
    %c0_0 = arith.constant 0 : index
    %0 = vector.load %arg1[%c0, %c0_0] : memref<16x22xf32, #tpu.memory_space<vmem>>, vector<16x22xf32>
    %1 = arith.truncf %0 : vector<16x22xf32> to vector<16x22xbf16>
    %c0_1 = arith.constant 0 : index
    %c0_2 = arith.constant 0 : index
    %2 = vector.load %arg2[%c0_1, %c0_2] : memref<22x80xbf16, #tpu.memory_space<vmem>>, vector<22x80xbf16>
    %cst = arith.constant dense<0.000000e+00> : vector<16x80xf32>
    %3 = tpu.matmul %1, %2, %cst {dimension_numbers = #tpu.dot_dimension_numbers<[1], [0], [0], [1], [0, 0, 1, 1], [], []>} : vector<16x22xbf16>, vector<22x80xbf16>, vector<16x80xf32> -> vector<16x80xf32>
    %c0_3 = arith.constant 0 : index
    %c0_4 = arith.constant 0 : index
    %4 = vector.load %arg3[%c0_3, %c0_4] : memref<1x80xf32, #tpu.memory_space<vmem>>, vector<1x80xf32>
    %5 = vector.broadcast %4 : vector<1x80xf32> to vector<16x80xf32>
    %6 = arith.addf %3, %5 : vector<16x80xf32>
    %7 = math.tanh %6 : vector<16x80xf32>
    %8 = arith.truncf %7 : vector<16x80xf32> to vector<16x80xbf16>
    %c0_5 = arith.constant 0 : index
    %c0_6 = arith.constant 0 : index
    %9 = vector.load %arg4[%c0_5, %c0_6] : memref<80x80xbf16, #tpu.memory_space<vmem>>, vector<80x80xbf16>
    %cst_7 = arith.constant dense<0.000000e+00> : vector<16x80xf32>
    %10 = tpu.matmul %8, %9, %cst_7 {dimension_numbers = #tpu.dot_dimension_numbers<[1], [0], [0], [1], [0, 0, 1, 1], [], []>} : vector<16x80xbf16>, vector<80x80xbf16>, vector<16x80xf32> -> vector<16x80xf32>
    %c0_8 = arith.constant 0 : index
    %c0_9 = arith.constant 0 : index
    %11 = vector.load %arg5[%c0_8, %c0_9] : memref<1x80xf32, #tpu.memory_space<vmem>>, vector<1x80xf32>
    %12 = vector.broadcast %11 : vector<1x80xf32> to vector<16x80xf32>
    %13 = arith.addf %10, %12 : vector<16x80xf32>
    %14 = math.tanh %13 : vector<16x80xf32>
    %c0_10 = arith.constant 0 : index
    %c0_11 = arith.constant 0 : index
    %15 = vector.load %arg6[%c0_10, %c0_11] : memref<16x80xf32, #tpu.memory_space<vmem>>, vector<16x80xf32>
    tpu.vector_store %arg6[%c0_10, %c0_11], %14 {strides = array<i32>} : memref<16x80xf32, #tpu.memory_space<vmem>>, vector<16x80xf32>,
    return
  }
  func.func @transform_0(%arg0: i32) -> (i32, i32) {
    %c0_i32 = arith.constant 0 : i32
    %c0_i32_0 = arith.constant 0 : i32
    return %arg0, %c0_i32 : i32, i32
  }
  func.func @transform_1(%arg0: i32) -> (i32, i32) {
    %c0_i32 = arith.constant 0 : i32
    %c0_i32_0 = arith.constant 0 : i32
    %c0_i32_1 = arith.constant 0 : i32
    return %c0_i32, %c0_i32_0 : i32, i32
  }
  func.func @transform_2(%arg0: i32) -> (i32, i32) {
    %c0_i32 = arith.constant 0 : i32
    %c0_i32_0 = arith.constant 0 : i32
    %c0_i32_1 = arith.constant 0 : i32
    return %c0_i32, %c0_i32_0 : i32, i32
  }
  func.func @transform_3(%arg0: i32) -> (i32, i32) {
    %c0_i32 = arith.constant 0 : i32
    %c0_i32_0 = arith.constant 0 : i32
    %c0_i32_1 = arith.constant 0 : i32
    return %c0_i32, %c0_i32_0 : i32, i32
  }
  func.func @transform_4(%arg0: i32) -> (i32, i32) {
    %c0_i32 = arith.constant 0 : i32
    %c0_i32_0 = arith.constant 0 : i32
    %c0_i32_1 = arith.constant 0 : i32
    return %c0_i32, %c0_i32_0 : i32, i32
  }
  func.func @transform_5(%arg0: i32) -> (i32, i32) {
    %c0_i32 = arith.constant 0 : i32
    %c0_i32_0 = arith.constant 0 : i32
    return %arg0, %c0_i32 : i32, i32
  }
}

</mosaic_0001>

<bundles_post_ra>
// kernel: tilt_actor_forward.1
= control target key start
LH: loop header
LB: loop body
LE: loop exit
PB: predicated region body
PF: predicated region fallthrough
CT: control target
= control target key end

     0   :  { %s494_s18 = smov 0   ;;  %s545_s0 = inlined_call_operand.vmem [shape: f32[48,22], index: 0, kind: input, shape index: {}]   ;;  %s546_s1 = inlined_call_operand.vmem [shape: bf16[22,80], index: 1, kind: input, shape index: {}]   ;;  %s547_s2 = inlined_call_operand.vmem [shape: f32[1,80], index: 2, kind: input, shape index: {}]   ;;  %s548_s3 = inlined_call_operand.vmem [shape: bf16[80,80], index: 3, kind: input, shape index: {}]   ;;  %s549_s4 = inlined_call_operand.vmem [shape: f32[1,80], index: 4, kind: input, shape index: {}]   ;;  %s550_s5 = inlined_call_operand.vmem [shape: f32[48,80], index: 5, kind: output, shape index: {}]  }
   0x1 LB: > { %s395_s19 = sadd.s32 4294967295, %s462_s18   ;;  %p399_p0 = scmp.ge.s32.totalorder %s462_s18, 1  ;;  %s462_s18 = sphi %s494_s18, %s15_s18  }
   0x2   : > { %p188_p1 = scmp.lt.s32.totalorder %s462_s18, 4 }
   0x4   : > { %p189_p2 = pnand %p399_p0, %p188_p1 }
   0x5   : > { %s400_s22 = sshll.u32 (!%p189_p2), %s395_s19, 1 }
   0x6   : > { %192 = sbr.rel (%p189_p2) target bundleno = 313 (0x139), region = 40  ;;  %p217_p3 = scmp.lt.s32.totalorder (!%p189_p2), %s400_s22, 5 }
   0xb   : > { %v234_v0 = vld [vmem:[%s546_s1 + $0x8] sm:$0x7]  ;;  %vm252_vm0 = vcmask 1042432   ;;  %s552_s22 = smov (!%p217_p3, %s400_s22), 5  ;;  %v432_v4 = vld [vmem:[%s546_s1] sm:$0xff]  ;;  %vm248_vm1 = vcmask 179200  }
   0xc   : > { %v244_v1 = vunpack.c.l.b16 %v234_v0  ;;  %s401_s23 = sshll.u32 %s552_s22, 3  ;;  %v437_v8 = vld [vmem:[%s548_s3 + $0x20] sm:$0xff]  ;;  %v436_v9 = vld [vmem:[%s548_s3 + $0x18] sm:$0xff]  ;;  %v435_v10 = vld [vmem:[%s548_s3 + $0x10] sm:$0xff]  ;;  %vm317_vm2 = vcmask 654336  }
   0xd   : > { %s220_s28 = scalar_lea.vmem %s545_s0, %s401_s23  ;;  %324 = vmatpush.bf16.msra.mxu1 %v437_v8  ;;  %v434_v11 = vld [vmem:[%s548_s3 + $0x8] sm:$0xff]  ;;  %v433_v12 = vld [vmem:[%s548_s3] sm:$0xff]  ;;  %s226_s21 = scalar_lea.vmem %s550_s5, %s401_s23 }
   0xe   : > { %v246_v2 = vpack.c.b16 %v244_v1, %v244_v1  ;;  %v229_v5 = vld [vmem:[%s220_s28] sm:$0xff]  ;;  %v230_v6 = vld [vmem:[%s220_s28 + $0x8] sm:$0xff] }
   0xf   : > { %v231_v7 = vpack.c.bf16 %v230_v6, %v229_v5  ;;  %v446_v14 = vld [vmem:[%s547_s2] ss:$0 sm:$0xff] }
  0x10   : > { %v254_v3 = vsel %vm252_vm0, %v246_v2, 0  ;;  %v447_v21 = vld [vmem:[%s549_s4] ss:$0 sm:$0xff] }
  0x11   : > { %262 = vmatpush.bf16.msra.mxu0 %v254_v3  ;;  %325 = vmatpush.bf16.msra.mxu1 %v436_v9 }
  0x15   : > { %263 = vmatpush.bf16.msra.mxu0 %v432_v4  ;;  %326 = vmatpush.bf16.msra.mxu1 %v435_v10 }
  0x18   : > { %408 = vmatmul.msk.bf16.vlgmr.msra.gmra.mxu0 %vm248_vm1, %v231_v7 }
  0x19   : > { %327 = vmatpush.bf16.msra.mxu1 %v434_v11 }
  0x1d   : > { %328 = vmatpush.bf16.msra.mxu1 %v433_v12 }
  0x95   : > { %v265_v13 = vpop.f32.mrf.mxu0 }
  0x96   : > { %v266_v15 = vadd.f32 %v446_v14, %v265_v13 }
  0x98   : > { %448 = vtanh.f32 %v266_v15 }
  0x9d   : > { %v267_v16 = vpop.f32.mrf.mxu0 }
  0x9e   : > { %v268_v17 = vadd.f32 %v446_v14, %v267_v16  ;;  %v449_v18 = vpop.eup %448 }
  0xa0   : > { %450 = vtanh.f32 %v268_v17 }
  0xa6   : > { %v451_v19 = vpop.eup %450 }
  0xa7   : > { %v272_v20 = vpack.c.bf16 %v451_v19, %v449_v18 }
  0xa9   : > { %429 = vmatmul.msk.bf16.vlgmr.msra.gmra.mxu1 %vm317_vm2, %v272_v20 }
 0x126   : > { %v330_v22 = vpop.f32.mrf.mxu1 }
 0x127   : > { %v331_v23 = vadd.f32 %v447_v21, %v330_v22 }
 0x129   : > { %452 = vtanh.f32 %v331_v23 }
 0x12e   : > { %v332_v24 = vpop.f32.mrf.mxu1 }
 0x12f   : > { %v453_v25 = vpop.eup %452  ;;  %v333_v26 = vadd.f32 %v447_v21, %v332_v24 }
 0x130   : > { %337 = vst.msk [vmem:[%s226_s21] sm:$0xff] %vm317_vm2, %v453_v25 }
 0x131   : > { %454 = vtanh.f32 %v333_v26 }
 0x137   : > { %v455_v27 = vpop.eup %454 }
 0x138   : > { %338 = vst.msk [vmem:[%s226_s21 + $0x8] sm:$0xff] %vm317_vm2, %v455_v27 }
 0x139 PF: > { %s15_s18 = sadd.s32 1, %s462_s18  }
 0x13a   : > { %p12_p4 = scmp.ge.s32.totalorder %s15_s18, 5  }
 0x13c   :  { %14 = sbr.rel (!%p12_p4) target bundleno = 1 (0x1), region = 70 }

</bundles_post_ra>
